<compile_context>
chip_gen: v7x
topology: tpu7x:2x2x1
jax: 0.10.0
libtpu: 0.0.40
codegen_flags: <defaults>
</compile_context>

<pallas_src>
import functools
import numpy as np
import jax
import jax.numpy as jnp
from jax.experimental import pallas as pl
from jax.experimental.pallas import tpu as pltpu


def _round_up(n, m):
    return ((n + m - 1) // m) * m


# ----------------------------- Pallas kernel ---------------------------------
def resup_kernel(x_ref, m_ref, b1_ref, n_ref, o_ref, *, is_last):
    # x_ref : (Bblk, H+2, WCi_p)   bf16  NHWC rows flattened to W*Ci, zero-padded by one
    #                                    row top/bottom and in the lanes up to WCi_p.
    # m_ref : (3, WCi_p, WCi_p)    bf16  conv1 banded weights, one block per ky tap.
    # b1_ref: (1, WCi_p)           f32   conv1 bias tiled over W (zero in the lane pad).
    # n_ref : (6, WCi_p, WCo2_p)   bf16  deconv banded weights, block index = py*3 + r,
    #                                    r = 0: mid(iy), 1: up(iy-1), 2: dn(iy+1);
    #                                    columns already px-interleaved (2W, Co).
    # o_ref : (2, Bblk, H, WCo2_p) bf16  output rows, parity-major (oy = 2*iy + py).
    Bblk, Hp2, WCi_p = x_ref.shape
    H = Hp2 - 2
    WCo2_p = o_ref.shape[3]
    M = Bblk * H
    f32 = jnp.float32

    # ky row views of the padded input, built in-kernel from the single HBM copy of x.
    x_u = x_ref[:, 0:H, :].reshape(M, WCi_p)          # row iy-1
    x_c = x_ref[:, 1:H + 1, :].reshape(M, WCi_p)      # row iy (also the residual)
    x_d = x_ref[:, 2:H + 2, :].reshape(M, WCi_p)      # row iy+1

    # conv1 (3x3, pad 1) + bias: three accumulating MXU dots, K = WCi_p lane-dense.
    acc = jnp.dot(x_u, m_ref[0], preferred_element_type=f32)
    acc = acc + jnp.dot(x_c, m_ref[1], preferred_element_type=f32)
    acc = acc + jnp.dot(x_d, m_ref[2], preferred_element_type=f32)
    acc = acc + b1_ref[...]

    # ReLU + residual (residual = bf16-rounded input, see module-level notes).
    mid = jnp.maximum(acc, 0.0) + x_c.astype(f32)      # (M, WCi_p) f32

    # Row-shifted copies of `mid` for the deconv row taps, built per image (no rows
    # leak across image boundaries inside the batch block), kept in registers.
    mid3d = mid.reshape(Bblk, H, WCi_p)
    zrow = jnp.zeros((Bblk, 1, WCi_p), f32)
    up3d = jnp.concatenate([zrow, mid3d[:, :H - 1]], axis=1)   # up[iy] = mid[iy-1]
    dn3d = jnp.concatenate([mid3d[:, 1:], zrow], axis=1)       # dn[iy] = mid[iy+1]

    midb = mid.astype(jnp.bfloat16)
    upb = up3d.reshape(M, WCi_p).astype(jnp.bfloat16)
    dnb = dn3d.reshape(M, WCi_p).astype(jnp.bfloat16)

    # ConvTranspose2d(4, stride 2, pad 1): one output-row parity at a time.
    # Halves the live f32 accumulator; N = WCo2_p stays lane-dense / MXU-filling.
    for py in range(2):
        o = jnp.dot(midb, n_ref[3 * py + 0], preferred_element_type=f32)
        o = o + jnp.dot(upb, n_ref[3 * py + 1], preferred_element_type=f32)
        o = o + jnp.dot(dnb, n_ref[3 * py + 2], preferred_element_type=f32)
        o = jnp.tanh(o) if is_last else jnp.maximum(o, 0.0)
        o_ref[py] = o.reshape(Bblk, H, WCo2_p).astype(o_ref.dtype)


# ----------------------------- host-side weight packing ----------------------
def _build_conv1_mat(K1, W, WCi_p):
    """K1 (Cout=Ci, Cin=Ci, 3, 3) -> (3, WCi_p, WCi_p); tap ky multiplies input row
    iy-1+ky.  Width banding folds the kx taps + W padding; lane pad is zero."""
    Co, Ci = K1.shape[0], K1.shape[1]
    M3 = np.zeros((3, WCi_p, WCi_p), np.float32)
    for ky in range(3):
        for w in range(W):
            for kx in range(3):
                wi = w - 1 + kx
                if 0 <= wi < W:
                    M3[ky, wi * Ci:(wi + 1) * Ci, w * Co:(w + 1) * Co] = K1[:, :, ky, kx].T
    return M3


def _build_deconv_mat(K2, W, WCi_p, WCo2_p):
    """K2 ConvTranspose2d weight (Ci, Co, 4, 4) -> (6, WCi_p, WCo2_p).
    Block index = py*3 + r with py the output-row parity (oy = 2*iy + py) and
    r in {0: mid(iy), 1: up(iy-1), 2: dn(iy+1)}.  Columns = ox*Co + co with
    ox in [0, 2W) already px-interleaved.  Lane pads are zero."""
    Ci, Co = K2.shape[0], K2.shape[1]
    N6 = np.zeros((6, WCi_p, WCo2_p), np.float32)
    r_of_shift = {0: 0, -1: 1, 1: 2}
    for py in range(2):
        for ky in range(4):
            if (ky % 2) != ((py + 1) % 2):
                continue
            r = r_of_shift[(py + 1 - ky) // 2]        # input row iy = q + s, s=(py+1-ky)/2
            for ox in range(2 * W):
                for kx in range(4):
                    if (kx % 2) != ((ox + 1) % 2):
                        continue
                    ix = (ox + 1 - kx) // 2
                    if 0 <= ix < W:
                        rows = slice(ix * Ci, (ix + 1) * Ci)
                        cols = slice(ox * Co, (ox + 1) * Co)
                        N6[py * 3 + r, rows, cols] += K2[:, :, ky, kx]
    return N6


def pack_params(K1, b1, K2, W):
    """Pack PyTorch-layout weights into lane-padded banded matmul blocks.
    Host-side NumPy; call ONCE per weight set (outside jit)."""
    K1n = np.asarray(K1, np.float32)
    K2n = np.asarray(K2, np.float32)
    b1n = np.asarray(b1, np.float32)
    assert K1n.shape[0] == K1n.shape[1], "ResUpBlock2d.conv1 must map Ci -> Ci"
    Ci, Co = K2n.shape[0], K2n.shape[1]
    WCi_p = _round_up(W * Ci, 128)
    WCo2_p = _round_up(2 * W * Co, 128)
    M3 = _build_conv1_mat(K1n, W, WCi_p)
    N6 = _build_deconv_mat(K2n, W, WCi_p, WCo2_p)
    b1f = np.zeros((1, WCi_p), np.float32)
    b1f[0, :W * Ci] = np.tile(b1n, W)
    return (jnp.asarray(M3, jnp.bfloat16),
            jnp.asarray(b1f, jnp.float32),
            jnp.asarray(N6, jnp.bfloat16))


# ----------------------------- grid / batch-block selection -------------------
def _tensorcores_per_device():
    """2 for dual-TensorCore / megacore chips (v4, v7x); 1 for the single-TC inference
    chips (v5e, v6e).  Unknown kinds fall back to 1 (never split)."""
    try:
        kind = jax.devices()[0].device_kind.lower()
    except Exception:
        return 1
    if "lite" in kind:                       # v5e / v6e
        return 1
    if any(t in kind for t in ("v7", "7x", "v4")):
        return 2
    return 1


def _vmem_step_bytes(bblk, H, WCi_p, WCo2_p):
    """Rough per-grid-step VMEM footprint: double-buffered activation/output windows,
    single-buffered weights, and the f32 temporaries."""
    bf2, f4 = 2, 4
    x_win = 2 * bblk * (H + 2) * WCi_p * bf2
    o_win = 2 * 2 * bblk * H * WCo2_p * bf2
    w_res = (3 * WCi_p * WCi_p + 6 * WCi_p * WCo2_p) * bf2 + WCi_p * f4
    tmps = bblk * H * (4 * WCi_p + WCo2_p) * f4
    return x_win + o_win + w_res + tmps


def _pick_bblk(B, H, WCi_p, WCo2_p, *, vmem_budget=24 * 1024 * 1024):
    """Images per grid step.  Single-TC chips: largest feasible block (fewest sequential
    grid steps).  Dual-TC chips: keep >= 2 grid steps for the two TensorCores, but only
    when each step still fills the MXU rows (Bblk * H >= 128)."""
    tcores = _tensorcores_per_device()
    divs = [d for d in range(1, B + 1)
            if B % d == 0 and _vmem_step_bytes(d, H, WCi_p, WCo2_p) <= vmem_budget]
    if not divs:
        divs = [1]
    if tcores >= 2:
        split = [d for d in divs if B // d >= tcores and d * H >= 128]
        if split:
            return max(split)
    return max(divs)


# ----------------------------- forward wrapper --------------------------------
def res_up_block_2d(x_nchw, Mstk, b1f, Nstk, *, co, is_last=False):
    """Fused ResUpBlock2d forward.  Returns NCHW bf16 of shape (B, co, 2H, 2W)."""
    B, Ci, H, W = x_nchw.shape
    WCi, WCo2 = W * Ci, 2 * W * co
    WCi_p = Mstk.shape[1]
    WCo2_p = Nstk.shape[2]
    Bblk = _pick_bblk(B, H, WCi_p, WCo2_p)

    # NCHW -> (B, H+2, WCi_p) in bf16: cast FIRST (halves glue HBM traffic), fold W into
    # the lane axis, pad one zero row top/bottom (ky taps) and zero lanes up to WCi_p.
    xb = jnp.transpose(x_nchw.astype(jnp.bfloat16), (0, 2, 3, 1)).reshape(B, H, WCi)
    xpad = jnp.pad(xb, ((0, 0), (1, 1), (0, WCi_p - WCi)))

    flops = 2 * B * H * WCi_p * (3 * WCi_p + 6 * WCo2_p)
    transcend = 2 * B * H * WCo2_p if is_last else 0
    bytes_acc = (xpad.size * 2 + Mstk.size * 2 + b1f.size * 4 + Nstk.size * 2
                 + 2 * B * H * WCo2_p * 2)

    out_sub = pl.pallas_call(
        functools.partial(resup_kernel, is_last=is_last),
        out_shape=jax.ShapeDtypeStruct((2, B, H, WCo2_p), jnp.bfloat16),
        grid_spec=pltpu.PrefetchScalarGridSpec(
            num_scalar_prefetch=0,
            grid=(B // Bblk,),
            in_specs=[
                pl.BlockSpec((Bblk, H + 2, WCi_p), lambda b: (b, 0, 0)),
                # Constant-index weights: single-buffer (double-buffering buys nothing
                # and matters on v7x where VMEM is 64 MiB/core).
                pl.BlockSpec((3, WCi_p, WCi_p), lambda b: (0, 0, 0),
                             pipeline_mode=pl.Buffered(1)),
                pl.BlockSpec((1, WCi_p), lambda b: (0, 0),
                             pipeline_mode=pl.Buffered(1)),
                pl.BlockSpec((6, WCi_p, WCo2_p), lambda b: (0, 0, 0),
                             pipeline_mode=pl.Buffered(1)),
            ],
            out_specs=pl.BlockSpec((2, Bblk, H, WCo2_p), lambda b: (0, b, 0, 0)),
        ),
        compiler_params=pltpu.CompilerParams(
            dimension_semantics=("parallel",),
            vmem_limit_bytes=32 * 1024 * 1024),
        cost_estimate=pl.CostEstimate(flops=flops, transcendentals=transcend,
                                      bytes_accessed=bytes_acc),
    )(xpad, Mstk, b1f, Nstk)

    # Glue (all bf16): strip lane padding, then a single transpose combining the
    # remaining py row-interleave with the NHWC -> NCHW conversion.
    out = out_sub[..., :WCo2] if WCo2_p != WCo2 else out_sub
    out = out.reshape(2, B, H, 2 * W, co)
    out = jnp.transpose(out, (1, 4, 2, 0, 3)).reshape(B, co, 2 * H, 2 * W)
    return out


# ----------------------------- references ------------------------------------
def reference_f32(x_nchw, K1, b1, K2, *, is_last=False):
    dn = ('NCHW', 'OIHW', 'NCHW')
    hp = jax.lax.Precision.HIGHEST
    out = jax.lax.conv_general_dilated(x_nchw, K1, (1, 1), ((1, 1), (1, 1)),
                                       dimension_numbers=dn, precision=hp)
    out = out + b1[None, :, None, None]
    out = jnp.maximum(out, 0.0) + x_nchw
    K2f = jnp.transpose(K2, (1, 0, 2, 3))[:, :, ::-1, ::-1]
    out = jax.lax.conv_general_dilated(out, K2f, (1, 1), ((2, 2), (2, 2)),
                                       lhs_dilation=(2, 2),
                                       dimension_numbers=dn, precision=hp)
    return jnp.tanh(out) if is_last else jnp.maximum(out, 0.0)


def reference_bf16(x_nchw, K1, b1, K2, *, is_last=False):
    """Same math with bf16 rounding at the same points as the kernel
    (bf16 input/weights/intermediate/output, f32 accumulation)."""
    f32 = jnp.float32
    xq = x_nchw.astype(jnp.bfloat16).astype(f32)
    K1q = K1.astype(jnp.bfloat16).astype(f32)
    K2q = K2.astype(jnp.bfloat16).astype(f32)
    dn = ('NCHW', 'OIHW', 'NCHW')
    hp = jax.lax.Precision.HIGHEST
    out = jax.lax.conv_general_dilated(xq, K1q, (1, 1), ((1, 1), (1, 1)),
                                       dimension_numbers=dn, precision=hp)
    out = out + b1[None, :, None, None]
    out = jnp.maximum(out, 0.0) + xq
    out = out.astype(jnp.bfloat16).astype(f32)
    K2f = jnp.transpose(K2q, (1, 0, 2, 3))[:, :, ::-1, ::-1]
    out = jax.lax.conv_general_dilated(out, K2f, (1, 1), ((2, 2), (2, 2)),
                                       lhs_dilation=(2, 2),
                                       dimension_numbers=dn, precision=hp)
    out = jnp.tanh(out) if is_last else jnp.maximum(out, 0.0)
    return out.astype(jnp.bfloat16).astype(f32)


def init_params(key, Ci, Co):
    k1, k2, k3 = jax.random.split(key, 3)
    K1 = 0.1 * jax.random.normal(k1, (Ci, Ci, 3, 3), jnp.float32)   # conv1.weight (O,I,kh,kw)
    b1 = 0.1 * jax.random.normal(k2, (Ci,), jnp.float32)            # conv1.bias
    K2 = 0.1 * jax.random.normal(k3, (Ci, Co, 4, 4), jnp.float32)   # convT.weight (I,O,kh,kw)
    return K1, b1, K2


if __name__ == "__main__":
    key = jax.random.PRNGKey(0)
    B, Ci, Co, H, W = 2, 4, 8, 16, 16
    kx_, kp = jax.random.split(key)
    x = jax.random.normal(kx_, (B, Ci, H, W), jnp.float32)
    K1, b1, K2 = init_params(kp, Ci, Co)

    Mstk, b1f, Nstk = pack_params(K1, b1, K2, W)        # pack once per weight set
    fwd = jax.jit(res_up_block_2d, static_argnames=("co", "is_last"))

    for is_last in (False, True):
        out = jax.block_until_ready(fwd(x, Mstk, b1f, Nstk, co=Co, is_last=is_last))
        assert out.shape == (B, Co, 2 * H, 2 * W), out.shape
        out_f = np.asarray(out.astype(jnp.float32))

        ref_q = np.asarray(reference_bf16(x, K1, b1, K2, is_last=is_last))
        ref_f = np.asarray(reference_f32(x, K1, b1, K2, is_last=is_last))
        err_q = float(np.max(np.abs(out_f - ref_q)))
        err_f = float(np.max(np.abs(out_f - ref_f)))
        # Kernel computes in bf16 (f32 accumulation) and emits bf16: tolerance ~1 bf16
        # ulp vs the bf16-aware reference, looser vs the pure-f32 reference.
        if not np.allclose(out_f, ref_q, atol=1e-2, rtol=1e-2):
            raise AssertionError(
                f"is_last={is_last}: mismatch vs bf16-aware reference, max abs err = {err_q}")
        if not np.allclose(out_f, ref_f, atol=3e-2, rtol=3e-2):
            raise AssertionError(
                f"is_last={is_last}: mismatch vs f32 reference, max abs err = {err_f}")

    print("KERNEL_OK")
</pallas_src>

<mosaic_0001>
module attributes {stable_mosaic.version = 11 : i64} {
  func.func @resup_kernel(%arg0: i32, %arg1: memref<2x18x128xbf16, #tpu.memory_space<vmem>>, %arg2: memref<3x128x128xbf16, #tpu.memory_space<vmem>>, %arg3: memref<1x128xf32, #tpu.memory_space<vmem>>, %arg4: memref<6x128x256xbf16, #tpu.memory_space<vmem>>, %arg5: memref<2x2x16x256xbf16, #tpu.memory_space<vmem>>) attributes {dimension_semantics = [#tpu.dimension_semantics<parallel>], iteration_bounds = array<i64: 1>, scalar_prefetch = 0 : i64, scratch_operands = 0 : i64, tpu.core_type = #tpu.core_type<tc>, window_params = [{transform_indices = @transform_0, window_bounds = array<i64: 2, 18, 128>}, {pipeline_mode = #tpu.pipeline_mode<synchronous>, transform_indices = @transform_1, window_bounds = array<i64: 3, 128, 128>}, {pipeline_mode = #tpu.pipeline_mode<synchronous>, transform_indices = @transform_2, window_bounds = array<i64: 1, 128>}, {pipeline_mode = #tpu.pipeline_mode<synchronous>, transform_indices = @transform_3, window_bounds = array<i64: 6, 128, 256>}, {transform_indices = @transform_4, window_bounds = array<i64: 2, 2, 16, 256>}]} {
    %c0 = arith.constant 0 : index
    %c0_0 = arith.constant 0 : index
    %c0_1 = arith.constant 0 : index
    %0 = vector.load %arg1[%c0, %c0_0, %c0_1] : memref<2x18x128xbf16, #tpu.memory_space<vmem>>, vector<2x16x128xbf16>
    %1 = vector.shape_cast %0 : vector<2x16x128xbf16> to vector<32x128xbf16>
    %c0_2 = arith.constant 0 : index
    %c1 = arith.constant 1 : index
    %c0_3 = arith.constant 0 : index
    %2 = vector.load %arg1[%c0_2, %c1, %c0_3] : memref<2x18x128xbf16, #tpu.memory_space<vmem>>, vector<2x16x128xbf16>
    %3 = vector.shape_cast %2 : vector<2x16x128xbf16> to vector<32x128xbf16>
    %c0_4 = arith.constant 0 : index
    %c2 = arith.constant 2 : index
    %c0_5 = arith.constant 0 : index
    %4 = vector.load %arg1[%c0_4, %c2, %c0_5] : memref<2x18x128xbf16, #tpu.memory_space<vmem>>, vector<2x16x128xbf16>
    %5 = vector.shape_cast %4 : vector<2x16x128xbf16> to vector<32x128xbf16>
    %c0_6 = arith.constant 0 : index
    %c0_7 = arith.constant 0 : index
    %c0_8 = arith.constant 0 : index
    %6 = vector.load %arg2[%c0_6, %c0_7, %c0_8] : memref<3x128x128xbf16, #tpu.memory_space<vmem>>, vector<1x128x128xbf16>
    %7 = vector.shape_cast %6 : vector<1x128x128xbf16> to vector<128x128xbf16>
    %cst = arith.constant dense<0.000000e+00> : vector<32x128xf32>
    %8 = tpu.matmul %1, %7, %cst {dimension_numbers = #tpu.dot_dimension_numbers<[1], [0], [0], [1], [0, 0, 1, 1], [], []>} : vector<32x128xbf16>, vector<128x128xbf16>, vector<32x128xf32> -> vector<32x128xf32>
    %c1_9 = arith.constant 1 : index
    %c0_10 = arith.constant 0 : index
    %c0_11 = arith.constant 0 : index
    %9 = vector.load %arg2[%c1_9, %c0_10, %c0_11] : memref<3x128x128xbf16, #tpu.memory_space<vmem>>, vector<1x128x128xbf16>
    %10 = vector.shape_cast %9 : vector<1x128x128xbf16> to vector<128x128xbf16>
    %cst_12 = arith.constant dense<0.000000e+00> : vector<32x128xf32>
    %11 = tpu.matmul %3, %10, %cst_12 {dimension_numbers = #tpu.dot_dimension_numbers<[1], [0], [0], [1], [0, 0, 1, 1], [], []>} : vector<32x128xbf16>, vector<128x128xbf16>, vector<32x128xf32> -> vector<32x128xf32>
    %12 = arith.addf %8, %11 : vector<32x128xf32>
    %c2_13 = arith.constant 2 : index
    %c0_14 = arith.constant 0 : index
    %c0_15 = arith.constant 0 : index
    %13 = vector.load %arg2[%c2_13, %c0_14, %c0_15] : memref<3x128x128xbf16, #tpu.memory_space<vmem>>, vector<1x128x128xbf16>
    %14 = vector.shape_cast %13 : vector<1x128x128xbf16> to vector<128x128xbf16>
    %cst_16 = arith.constant dense<0.000000e+00> : vector<32x128xf32>
    %15 = tpu.matmul %5, %14, %cst_16 {dimension_numbers = #tpu.dot_dimension_numbers<[1], [0], [0], [1], [0, 0, 1, 1], [], []>} : vector<32x128xbf16>, vector<128x128xbf16>, vector<32x128xf32> -> vector<32x128xf32>
    %16 = arith.addf %12, %15 : vector<32x128xf32>
    %c0_17 = arith.constant 0 : index
    %c0_18 = arith.constant 0 : index
    %17 = vector.load %arg3[%c0_17, %c0_18] : memref<1x128xf32, #tpu.memory_space<vmem>>, vector<1x128xf32>
    %18 = vector.broadcast %17 : vector<1x128xf32> to vector<32x128xf32>
    %19 = arith.addf %16, %18 : vector<32x128xf32>
    %cst_19 = arith.constant 0.000000e+00 : f32
    %20 = vector.broadcast %cst_19 : f32 to vector<32x128xf32>
    %21 = arith.maximumf %19, %20 : vector<32x128xf32>
    %22 = arith.extf %3 : vector<32x128xbf16> to vector<32x128xf32>
    %23 = arith.addf %21, %22 : vector<32x128xf32>
    %24 = vector.shape_cast %23 : vector<32x128xf32> to vector<2x16x128xf32>
    %cst_20 = arith.constant 0.000000e+00 : f32
    %25 = vector.broadcast %cst_20 : f32 to vector<2x1x128xf32>
    %26 = vector.extract_strided_slice %24 {offsets = [0, 0, 0], sizes = [2, 15, 128], strides = [1, 1, 1]} : vector<2x16x128xf32> to vector<2x15x128xf32>
    %27 = tpu.concatenate %25, %26 in 1 : vector<2x1x128xf32>, vector<2x15x128xf32> -> vector<2x16x128xf32>
    %28 = vector.extract_strided_slice %24 {offsets = [0, 1, 0], sizes = [2, 15, 128], strides = [1, 1, 1]} : vector<2x16x128xf32> to vector<2x15x128xf32>
    %29 = tpu.concatenate %28, %25 in 1 : vector<2x15x128xf32>, vector<2x1x128xf32> -> vector<2x16x128xf32>
    %30 = arith.truncf %23 : vector<32x128xf32> to vector<32x128xbf16>
    %31 = vector.shape_cast %27 : vector<2x16x128xf32> to vector<32x128xf32>
    %32 = arith.truncf %31 : vector<32x128xf32> to vector<32x128xbf16>
    %33 = vector.shape_cast %29 : vector<2x16x128xf32> to vector<32x128xf32>
    %34 = arith.truncf %33 : vector<32x128xf32> to vector<32x128xbf16>
    %c0_21 = arith.constant 0 : index
    %c0_22 = arith.constant 0 : index
    %c0_23 = arith.constant 0 : index
    %35 = vector.load %arg4[%c0_21, %c0_22, %c0_23] : memref<6x128x256xbf16, #tpu.memory_space<vmem>>, vector<1x128x256xbf16>
    %36 = vector.shape_cast %35 : vector<1x128x256xbf16> to vector<128x256xbf16>
    %cst_24 = arith.constant dense<0.000000e+00> : vector<32x256xf32>
    %37 = tpu.matmul %30, %36, %cst_24 {dimension_numbers = #tpu.dot_dimension_numbers<[1], [0], [0], [1], [0, 0, 1, 1], [], []>} : vector<32x128xbf16>, vector<128x256xbf16>, vector<32x256xf32> -> vector<32x256xf32>
    %c1_25 = arith.constant 1 : index
    %c0_26 = arith.constant 0 : index
    %c0_27 = arith.constant 0 : index
    %38 = vector.load %arg4[%c1_25, %c0_26, %c0_27] : memref<6x128x256xbf16, #tpu.memory_space<vmem>>, vector<1x128x256xbf16>
    %39 = vector.shape_cast %38 : vector<1x128x256xbf16> to vector<128x256xbf16>
    %cst_28 = arith.constant dense<0.000000e+00> : vector<32x256xf32>
    %40 = tpu.matmul %32, %39, %cst_28 {dimension_numbers = #tpu.dot_dimension_numbers<[1], [0], [0], [1], [0, 0, 1, 1], [], []>} : vector<32x128xbf16>, vector<128x256xbf16>, vector<32x256xf32> -> vector<32x256xf32>
    %41 = arith.addf %37, %40 : vector<32x256xf32>
    %c2_29 = arith.constant 2 : index
    %c0_30 = arith.constant 0 : index
    %c0_31 = arith.constant 0 : index
    %42 = vector.load %arg4[%c2_29, %c0_30, %c0_31] : memref<6x128x256xbf16, #tpu.memory_space<vmem>>, vector<1x128x256xbf16>
    %43 = vector.shape_cast %42 : vector<1x128x256xbf16> to vector<128x256xbf16>
    %cst_32 = arith.constant dense<0.000000e+00> : vector<32x256xf32>
    %44 = tpu.matmul %34, %43, %cst_32 {dimension_numbers = #tpu.dot_dimension_numbers<[1], [0], [0], [1], [0, 0, 1, 1], [], []>} : vector<32x128xbf16>, vector<128x256xbf16>, vector<32x256xf32> -> vector<32x256xf32>
    %45 = arith.addf %41, %44 : vector<32x256xf32>
    %cst_33 = arith.constant 0.000000e+00 : f32
    %46 = vector.broadcast %cst_33 : f32 to vector<32x256xf32>
    %47 = arith.maximumf %45, %46 : vector<32x256xf32>
    %48 = vector.shape_cast %47 : vector<32x256xf32> to vector<2x16x256xf32>
    %49 = arith.truncf %48 : vector<2x16x256xf32> to vector<2x16x256xbf16>
    %c0_34 = arith.constant 0 : index
    %c0_35 = arith.constant 0 : index
    %c0_36 = arith.constant 0 : index
    %c0_37 = arith.constant 0 : index
    %50 = vector.load %arg5[%c0_34, %c0_35, %c0_36, %c0_37] : memref<2x2x16x256xbf16, #tpu.memory_space<vmem>>, vector<1x2x16x256xbf16>
    %51 = vector.shape_cast %50 : vector<1x2x16x256xbf16> to vector<2x16x256xbf16>
    %52 = vector.shape_cast %49 : vector<2x16x256xbf16> to vector<1x2x16x256xbf16>
    tpu.vector_store %arg5[%c0_34, %c0_35, %c0_36, %c0_37], %52 {strides = array<i32>} : memref<2x2x16x256xbf16, #tpu.memory_space<vmem>>, vector<1x2x16x256xbf16>,
    %c3 = arith.constant 3 : index
    %c0_38 = arith.constant 0 : index
    %c0_39 = arith.constant 0 : index
    %53 = vector.load %arg4[%c3, %c0_38, %c0_39] : memref<6x128x256xbf16, #tpu.memory_space<vmem>>, vector<1x128x256xbf16>
    %54 = vector.shape_cast %53 : vector<1x128x256xbf16> to vector<128x256xbf16>
    %cst_40 = arith.constant dense<0.000000e+00> : vector<32x256xf32>
    %55 = tpu.matmul %30, %54, %cst_40 {dimension_numbers = #tpu.dot_dimension_numbers<[1], [0], [0], [1], [0, 0, 1, 1], [], []>} : vector<32x128xbf16>, vector<128x256xbf16>, vector<32x256xf32> -> vector<32x256xf32>
    %c4 = arith.constant 4 : index
    %c0_41 = arith.constant 0 : index
    %c0_42 = arith.constant 0 : index
    %56 = vector.load %arg4[%c4, %c0_41, %c0_42] : memref<6x128x256xbf16, #tpu.memory_space<vmem>>, vector<1x128x256xbf16>
    %57 = vector.shape_cast %56 : vector<1x128x256xbf16> to vector<128x256xbf16>
    %cst_43 = arith.constant dense<0.000000e+00> : vector<32x256xf32>
    %58 = tpu.matmul %32, %57, %cst_43 {dimension_numbers = #tpu.dot_dimension_numbers<[1], [0], [0], [1], [0, 0, 1, 1], [], []>} : vector<32x128xbf16>, vector<128x256xbf16>, vector<32x256xf32> -> vector<32x256xf32>
    %59 = arith.addf %55, %58 : vector<32x256xf32>
    %c5 = arith.constant 5 : index
    %c0_44 = arith.constant 0 : index
    %c0_45 = arith.constant 0 : index
    %60 = vector.load %arg4[%c5, %c0_44, %c0_45] : memref<6x128x256xbf16, #tpu.memory_space<vmem>>, vector<1x128x256xbf16>
    %61 = vector.shape_cast %60 : vector<1x128x256xbf16> to vector<128x256xbf16>
    %cst_46 = arith.constant dense<0.000000e+00> : vector<32x256xf32>
    %62 = tpu.matmul %34, %61, %cst_46 {dimension_numbers = #tpu.dot_dimension_numbers<[1], [0], [0], [1], [0, 0, 1, 1], [], []>} : vector<32x128xbf16>, vector<128x256xbf16>, vector<32x256xf32> -> vector<32x256xf32>
    %63 = arith.addf %59, %62 : vector<32x256xf32>
    %cst_47 = arith.constant 0.000000e+00 : f32
    %64 = vector.broadcast %cst_47 : f32 to vector<32x256xf32>
    %65 = arith.maximumf %63, %64 : vector<32x256xf32>
    %66 = vector.shape_cast %65 : vector<32x256xf32> to vector<2x16x256xf32>
    %67 = arith.truncf %66 : vector<2x16x256xf32> to vector<2x16x256xbf16>
    %c1_48 = arith.constant 1 : index
    %c0_49 = arith.constant 0 : index
    %c0_50 = arith.constant 0 : index
    %c0_51 = arith.constant 0 : index
    %68 = vector.load %arg5[%c1_48, %c0_49, %c0_50, %c0_51] : memref<2x2x16x256xbf16, #tpu.memory_space<vmem>>, vector<1x2x16x256xbf16>
    %69 = vector.shape_cast %68 : vector<1x2x16x256xbf16> to vector<2x16x256xbf16>
    %70 = vector.shape_cast %67 : vector<2x16x256xbf16> to vector<1x2x16x256xbf16>
    tpu.vector_store %arg5[%c1_48, %c0_49, %c0_50, %c0_51], %70 {strides = array<i32>} : memref<2x2x16x256xbf16, #tpu.memory_space<vmem>>, vector<1x2x16x256xbf16>,
    return
  }
  func.func @transform_0(%arg0: i32) -> (i32, i32, i32) {
    %c0_i32 = arith.constant 0 : i32
    %c0_i32_0 = arith.constant 0 : i32
    %c0_i32_1 = arith.constant 0 : i32
    return %arg0, %c0_i32, %c0_i32_0 : i32, i32, i32
  }
  func.func @transform_1(%arg0: i32) -> (i32, i32, i32) {
    %c0_i32 = arith.constant 0 : i32
    %c0_i32_0 = arith.constant 0 : i32
    %c0_i32_1 = arith.constant 0 : i32
    %c0_i32_2 = arith.constant 0 : i32
    return %c0_i32, %c0_i32_0, %c0_i32_1 : i32, i32, i32
  }
  func.func @transform_2(%arg0: i32) -> (i32, i32) {
    %c0_i32 = arith.constant 0 : i32
    %c0_i32_0 = arith.constant 0 : i32
    %c0_i32_1 = arith.constant 0 : i32
    return %c0_i32, %c0_i32_0 : i32, i32
  }
  func.func @transform_3(%arg0: i32) -> (i32, i32, i32) {
    %c0_i32 = arith.constant 0 : i32
    %c0_i32_0 = arith.constant 0 : i32
    %c0_i32_1 = arith.constant 0 : i32
    %c0_i32_2 = arith.constant 0 : i32
    return %c0_i32, %c0_i32_0, %c0_i32_1 : i32, i32, i32
  }
  func.func @transform_4(%arg0: i32) -> (i32, i32, i32, i32) {
    %c0_i32 = arith.constant 0 : i32
    %c0_i32_0 = arith.constant 0 : i32
    %c0_i32_1 = arith.constant 0 : i32
    %c0_i32_2 = arith.constant 0 : i32
    return %c0_i32, %arg0, %c0_i32_0, %c0_i32_1 : i32, i32, i32, i32
  }
}

</mosaic_0001>

<bundles_post_ra>
// kernel: res_up_block_2d.1
= control target key start
LH: loop header
LB: loop body
LE: loop exit
PB: predicated region body
PF: predicated region fallthrough
CT: control target
= control target key end

     0   :  { %9 = vsyncpa [#allocation3], 0  ;;  %s2095_s15 = smov [#allocation2]   ;;  %s2401_s0 = inlined_call_operand.vmem [shape: bf16[2,18,128], index: 0, kind: input, shape index: {}]   ;;  %s2402_s1 = inlined_call_operand.vmem [shape: bf16[3,128,128], index: 1, kind: input, shape index: {}]   ;;  %s2403_s2 = inlined_call_operand.vmem [shape: f32[1,128], index: 2, kind: input, shape index: {}]   ;;  %s2404_s3 = inlined_call_operand.hbm [shape: bf16[6,128,256], index: 3, kind: input, shape index: {}]   ;;  %s2405_s4 = inlined_call_operand.vmem [shape: bf16[2,2,16,256], index: 4, kind: output, shape index: {}]  }
   0x1   :  { %s21_s16 = sshll.u32 %s2095_s15, 4  ;;  %s2071_s19 = scalar_lea.hbm %s2404_s3, 12288  ;;  %s22_s16 = int_to_ptr.vmem [resolvable:$true] %s21_s16 }
   0x2   :  { %p2072_p0 = scmp.ne.s32.totalorder %s2404_s3, %s2071_s19  ;;  %p2075_p1 = scmp.lt.u32.totalorder %s2071_s19, %s2404_s3 }
   0x4   :  { %p2077_p2 = pnand %p2075_p1, %p2072_p0 }
   0x6   :  { %2080 = shalt.err (!%p2077_p2)
}
   0x7   :  { %s2081_s24 = scalar_lea.vmem %s22_s16, 12288  ;;  %p2086_p4 = scmp.lt.s32.totalorder %s22_s16, %s22_s16 }
   0x8   :  { %p2082_p3 = scmp.ne.s32.totalorder %s22_s16, %s2081_s24  ;;  %p2087_p5 = scmp.lt.s32.totalorder %s2081_s24, %s2081_s24 }
   0xa   :  { %p2088_p6 = por %p2087_p5, %p2086_p4 }
   0xc   :  { %p2089_p7 = pnand %p2088_p6, %p2082_p3 }
   0xe   :  { %2092 = shalt.err (!%p2089_p7)
}
   0xf   :  { %s2096_s25 = smov 128   ;;  %s2097_s26 = smov 8  }
  0x10   :  { %27 = dma.hbm_to_vmem [thread:$0]  %s2404_s3, 12288, %s22_s16, [#allocation3], %s2096_s25, %s2096_s25, %s2097_s26  }
  0x11   :  { %2093 = dma.done.wait [#allocation3], 12288  }
  0x12   :  { %2094 = vsyncadd [#allocation3], 4294955008  ;;  %v1901_v0 = vld [vmem:[%s2402_s1] sm:$0xff]   ;;  %v1902_v1 = vld [vmem:[%s2402_s1 + $0x8] sm:$0xff]   ;;  %vm38_vm0 = vsmask.f32 3328 }
  0x13   :  { %1800 = vmatprep.subr.bf16.mxu0 %v1901_v0  ;;  %v1903_v2 = vld [vmem:[%s2402_s1 + $0x10] sm:$0xff]   ;;  %v1904_v3 = vld [vmem:[%s2402_s1 + $0x18] sm:$0xff]   ;;  %v1909_v4 = vld [vmem:[%s2402_s1 + $0x40] sm:$0xff]   ;;  %vm39_vm1 = vsmask.f32 7440  ;;  %vm101_vm2 = vcmask 1042432  }
  0x14   :  { %1801 = vmatpush3.bf16.msra.mxu0 %v1901_v0  ;;  %v32_v5 = vld [vmem:[%s2401_s0] sm:$0xf]  ;;  %v2158_v6 = vld [vmem:[%s2401_s0 + $0x4] sm:$0xf]  ;;  %1780 = vmatprep.subr.bf16.mxu1 %v1909_v4  ;;  %v1912_v11 = vld [vmem:[%s2402_s1 + $0x48] sm:$0xff]   ;;  %vm102_vm3 = vcmask 1046532  }
  0x15   :  { %1802 = vmatprep.subr.bf16.mxu0 %v1902_v1  ;;  %v42_v7 = vshrl.u32 %v32_v5, 16  ;;  %1781 = vmatpush3.bf16.msra.mxu1 %v1909_v4  ;;  %v45_v8 = vshll.u32 %v32_v5, 16  ;;  %v1569_v9 = vcombine.low %v32_v5, %v2158_v6  ;;  %v1905_v10 = vld [vmem:[%s2402_s1 + $0x20] sm:$0xff]   ;;  %v55_v12 = vshrl.u32 %v2158_v6, 16  ;;  %v1906_v13 = vld [vmem:[%s2402_s1 + $0x28] sm:$0xff]   ;;  %v1915_v18 = vld [vmem:[%s2402_s1 + $0x50] sm:$0xff]  }
  0x16   :  { %1782 = vmatprep.subr.bf16.mxu1 %v1912_v11  ;;  %v51_v15 = vshll.u32 %v2158_v6, 16  ;;  %v2175_v17 = vld [vmem:[%s2401_s0 + $0xc] sm:$0xf]  ;;  %v2183_v19 = vld [vmem:[%s2401_s0 + $0x10] sm:$0xf]  ;;  %v1917_v21 = vld [vmem:[%s2402_s1 + $0x58] sm:$0xff]  }
  0x17   :  { %1816 = vmatprep.mubr.bf16.mxu0 %v1569_v9  ;;  %v44_v14 = vrot.slane %v42_v7, 4  ;;  %v47_v16 = vrot.slane %v45_v8, 5  ;;  %v66_v20 = vshrl.u32 %v2175_v17, 16  ;;  %v1907_v22 = vld [vmem:[%s2402_s1 + $0x30] sm:$0xff]   ;;  %v69_v23 = vshll.u32 %v2175_v17, 16  ;;  %v1919_v28 = vld [vmem:[%s2402_s1 + $0x60] sm:$0xff]   ;;  %vm2210_vm4 = vmor %vm38_vm0, %vm39_vm1 }
  0x18   :  { %1803 = vmatpush3.bf16.msra.mxu0 %v1902_v1  ;;  %v53_v24 = vrot.slane %v51_v15, 5  ;;  %v79_v25 = vshrl.u32 %v2183_v19, 16  ;;  %v57_v27 = vrot.slane %v55_v12, 4  ;;  %v106_v29 = vrot.slane %v2158_v6, 5  ;;  %v1908_v32 = vld [vmem:[%s2402_s1 + $0x38] sm:$0xff]   ;;  %v1921_v37 = vld [vmem:[%s2402_s1 + $0x68] sm:$0xff]   ;;  %vm2224_vm5 = vmor %vm101_vm2, %vm102_vm3 }
  0x19   :  { %1804 = vmatprep.subr.bf16.mxu0 %v1903_v2  ;;  %1783 = vmatpush3.bf16.msra.mxu1 %v1912_v11  ;;  %v48_v26 = vor.u32 %v47_v16, %v44_v14  ;;  %v75_v31 = vshll.u32 %v2183_v19, 16  ;;  %v68_v33 = vrot.slane %v66_v20, 4  ;;  %v71_v34 = vrot.slane %v69_v23, 5  ;;  %v36_v39 = vld [vmem:[%s2401_s0 + $0x8] sm:$0x1]  ;;  %v1911_v50 = vld [vmem:[%s2402_s1 + $0x80] sm:$0xff]  }
  0x1a   :  { %1784 = vmatprep.subr.bf16.mxu1 %v1915_v18  ;;  %v58_v30 = vor.u32 %v57_v27, %v53_v24  ;;  %v81_v36 = vrot.slane %v79_v25, 4  ;;  %v108_v42 = vrot.slane %v106_v29, 4  ;;  %v61_v43 = vshll.u32 %v36_v39, 16  ;;  %v2217_v46 = vld [vmem:[%s2401_s0 + $0x14] sm:$0x1]  ;;  %v1914_v0 = vld [vmem:[%s2402_s1 + $0x88] sm:$0xff]  }
  0x1b   :  { %v49_v35 = vrot.slane %v48_v26, 4  ;;  %v77_v38 = vrot.slane %v75_v31, 5  ;;  %v109_v44 = vrot.slane %v36_v39, 5  ;;  %v72_v45 = vor.u32 %v71_v34, %v68_v33  ;;  %v93_v48 = vld [vmem:[%s2401_s0] sm:$0xe]  ;;  %v1923_v51 = vld [vmem:[%s2402_s1 + $0x70] sm:$0xff]  }
  0x1c   :  { %1805 = vmatpush3.bf16.msra.mxu0 %v1903_v2  ;;  %v59_v41 = vrot.slane %v58_v30, 4  ;;  %v63_v53 = vrot.slane %v61_v43, 5  ;;  %v85_v54 = vshll.u32 %v2217_v46, 16  ;;  %v1541_v55 = vrot.slane %v93_v48, 9  ;;  %v1925_v1 = vld [vmem:[%s2402_s1 + $0x78] sm:$0xff]   ;;  %v1916_v5 = vld [vmem:[%s2402_s1 + $0x90] sm:$0xff]  }
  0x1d   :  { %1806 = vmatprep.subr.bf16.mxu0 %v1904_v3  ;;  %1785 = vmatpush3.bf16.msra.mxu1 %v1915_v18  ;;  %v82_v47 = vor.u32 %v81_v36, %v77_v38  ;;  %v2236_v52 = vsel %vm2210_vm4, %v49_v35, %v53_v24  ;;  %v1570_v56 = vcombine.low %v2175_v17, %v2183_v19  ;;  %v73_v58 = vrot.slane %v72_v45, 4  ;;  %v1929_v6 = vld [vmem:[#allocation2 + $0x84] ss:$8 sps:$4 sm:$0xff]   ;;  %v1918_v7 = vld [vmem:[%s2402_s1 + $0x98] sm:$0xff]   ;;  %v1927_v9 = vld [vmem:[#allocation2 + $0x80] ss:$8 sps:$4 sm:$0xff]  }
  0x1e   :  { %1786 = vmatprep.subr.bf16.mxu1 %v1917_v21  ;;  %v2243_v57 = vsel %vm2210_vm4, %v59_v41, %v63_v53  ;;  %v110_v59 = vsel %vm2224_vm5, %v108_v42, %v109_v44  ;;  %v87_v62 = vrot.slane %v85_v54, 5  ;;  %v107_v63 = vsel %vm2224_vm5, %v1541_v55, %v106_v29  ;;  %v1933_v11 = vld [vmem:[#allocation2 + $0x90] ss:$8 sps:$4 sm:$0xff]   ;;  %v1920_v12 = vld [vmem:[%s2402_s1 + $0xa0] sm:$0xff]   ;;  %v1922_v15 = vld [vmem:[%s2402_s1 + $0xa8] sm:$0xff]  }
  0x1f   :  { %v1559_v60 = vcombine.low %v2236_v52, %v2243_v57  ;;  %v83_v61 = vrot.slane %v82_v47, 4  ;;  %v1595_v2 = vcombine.low %v107_v63, %v110_v59  ;;  %v1939_v14 = vld [vmem:[#allocation2 + $0xa0] ss:$8 sps:$4 sm:$0xff]   ;;  %v1947_v16 = vld [vmem:[#allocation2 + $0xb4] ss:$8 sps:$4 sm:$0xff]   ;;  %v116_v23 = vrot.slane %v2217_v46, 5 }
  0x20   :  { %1807 = vmatpush3.bf16.msra.mxu0 %v1904_v3  ;;  %v2259_v3 = vsel %vm2210_vm4, %v73_v58, %v77_v38  ;;  %v1945_v17 = vld [vmem:[#allocation2 + $0xb0] ss:$8 sps:$4 sm:$0xff]   ;;  %v94_v20 = vld [vmem:[%s2401_s0 + $0xc] sm:$0xe]  ;;  %v1938_v30 = vld [vmem:[#allocation2 + $0x214] ss:$8 sps:$4 sm:$0xff]  }
  0x21   :  { %1808 = vmatprep.subr.bf16.mxu0 %v1905_v10  ;;  %1787 = vmatpush3.bf16.msra.mxu1 %v1917_v21  ;;  %v2263_v4 = vsel %vm2210_vm4, %v83_v61, %v87_v62  ;;  %v1924_v18 = vld [vmem:[%s2402_s1 + $0xb0] sm:$0xff]   ;;  %v113_v21 = vrot.slane %v2183_v19, 5  ;;  %v1542_v24 = vrot.slane %v94_v20, 9  ;;  %v1932_v26 = vld [vmem:[#allocation2 + $0x204] ss:$8 sps:$4 sm:$0xff]   ;;  %v2098_v55 = vmov 0  }
  0x22   :  { %1788 = vmatprep.subr.bf16.mxu1 %v1919_v28  ;;  %1796 = vmatprep.mubr.bf16.mxu1 %v1559_v60  ;;  %v1560_v8 = vcombine.low %v2259_v3, %v2263_v4  ;;  %v1936_v31 = vld [vmem:[#allocation2 + $0x210] ss:$8 sps:$4 sm:$0xff]   ;;  %v1942_v33 = vld [vmem:[#allocation2 + $0x220] ss:$8 sps:$4 sm:$0xff]   ;;  %v1950_v34 = vld [vmem:[#allocation2 + $0x234] ss:$8 sps:$4 sm:$0xff]  }
  0x23   :  { %v115_v25 = vrot.slane %v113_v21, 4  ;;  %v114_v19 = vsel %vm2224_vm5, %v1542_v24, %v113_v21  ;;  %v1948_v35 = vld [vmem:[#allocation2 + $0x230] ss:$8 sps:$4 sm:$0xff]   ;;  %v1953_v36 = vld [vmem:[#allocation2 + $0xc4] ss:$8 sps:$4 sm:$0xff]   ;;  %vm516_vm6 = vcmask 1040384  }
  0x24   :  { %1809 = vmatpush3.bf16.msra.mxu0 %v1905_v10  ;;  %v1935_v10 = vld [vmem:[#allocation2 + $0x94] ss:$8 sps:$4 sm:$0xff]   ;;  %v1951_v38 = vld [vmem:[#allocation2 + $0xc0] ss:$8 sps:$4 sm:$0xff]   ;;  %v1957_v42 = vld [vmem:[#allocation2 + $0xd0] ss:$8 sps:$4 sm:$0xff]  }
  0x25   :  { %1810 = vmatprep.subr.bf16.mxu0 %v1906_v13  ;;  %1789 = vmatpush3.bf16.msra.mxu1 %v1919_v28  ;;  %v117_v27 = vsel %vm2224_vm5, %v115_v25, %v116_v23  ;;  %v1930_v28 = vld [vmem:[#allocation2 + $0x200] ss:$8 sps:$4 sm:$0xff]   ;;  %v1959_v40 = vld [vmem:[#allocation2 + $0xd4] ss:$8 sps:$4 sm:$0xff]   ;;  %v1960_v43 = vld [vmem:[#allocation2 + $0x250] ss:$8 sps:$4 sm:$0xff]  }
  0x26   :  { %1790 = vmatprep.subr.bf16.mxu1 %v1921_v37  ;;  %v1596_v29 = vcombine.low %v114_v19, %v117_v27  ;;  %v1954_v39 = vld [vmem:[#allocation2 + $0x240] ss:$8 sps:$4 sm:$0xff]   ;;  %v1962_v41 = vld [vmem:[#allocation2 + $0x254] ss:$8 sps:$4 sm:$0xff]   ;;  %v1965_v44 = vld [vmem:[#allocation2 + $0xe4] ss:$8 sps:$4 sm:$0xff]  }
  0x27   :  { %v1968_v45 = vld [vmem:[#allocation2 + $0x264] ss:$8 sps:$4 sm:$0xff]   ;;  %v1963_v46 = vld [vmem:[#allocation2 + $0xe0] ss:$8 sps:$4 sm:$0xff]   ;;  %v1971_v48 = vld [vmem:[#allocation2 + $0xf4] ss:$8 sps:$4 sm:$0xff]  }
  0x28   :  { %1811 = vmatpush3.bf16.msra.mxu0 %v1906_v13  ;;  %v1941_v13 = vld [vmem:[#allocation2 + $0xa4] ss:$8 sps:$4 sm:$0xff]   ;;  %v1966_v47 = vld [vmem:[#allocation2 + $0x260] ss:$8 sps:$4 sm:$0xff]   ;;  %v1974_v49 = vld [vmem:[#allocation2 + $0x274] ss:$8 sps:$4 sm:$0xff]  }
  0x29   :  { %1812 = vmatprep.subr.bf16.mxu0 %v1907_v22  ;;  %1791 = vmatpush3.bf16.msra.mxu1 %v1921_v37  ;;  %v1956_v37 = vld [vmem:[#allocation2 + $0x244] ss:$8 sps:$4 sm:$0xff]   ;;  %v1605_v62 = vld [vmem:[%s2403_s2] ss:$0 sm:$0xff]  ;;  %vm529_vm7 = vcmask 1046528   ;;  %vm1622_vm8 = vmneg %vm516_vm6  ;;  %vm2099_vm9 = vmmov 1  }
  0x2a   :  { %1792 = vmatprep.subr.bf16.mxu1 %v1923_v51  ;;  %v1977_v53 = vld [vmem:[#allocation2 + $0x4] ss:$8 sps:$4 sm:$0xff]   ;;  %vm2313_vm10 = vmpackc.low %vm2099_vm9, %vm1622_vm8 }
  0x2b   :  { %v1980_v54 = vld [vmem:[#allocation2 + $0x184] ss:$8 sps:$4 sm:$0xff]   ;;  %vm2355_vm11 = vmpackc.low %vm529_vm7, %vm2099_vm9 }
  0x2c   :  { %1813 = vmatpush3.bf16.msra.mxu0 %v1907_v22  ;;  %v1926_v22 = vld [vmem:[%s2402_s1 + $0xb8] sm:$0xff]  }
  0x2d   :  { %1814 = vmatprep.subr.bf16.mxu0 %v1908_v32  ;;  %1793 = vmatpush3.bf16.msra.mxu1 %v1923_v51  ;;  %v1972_v51 = vld [vmem:[#allocation2 + $0x270] ss:$8 sps:$4 sm:$0xff]  }
  0x2e   :  { %1794 = vmatprep.subr.bf16.mxu1 %v1925_v1 }
  0x30   :  { %1815 = vmatpush3.bf16.msra.mxu0 %v1908_v32  ;;  %v1944_v32 = vld [vmem:[#allocation2 + $0x224] ss:$8 sps:$4 sm:$0xff]  }
  0x31   :  { %1820 = vmatprep.subr.bf16.mxu0 %v1911_v50  ;;  %1795 = vmatpush3.bf16.msra.mxu1 %v1925_v1 }
  0x32   :  { %661 = vmatprep.subr.bf16.mxu1 %v1929_v6 }
  0x33   :  { %1817 = vmatmul.mubr.bf16.vlgmr.msra.gmra.mrb[0].mxu0 %v1570_v56 }
  0x34   :  { %1821 = vmatpush3.bf16.msra.mxu0 %v1911_v50  ;;  %1836 = vmatprep.mubr.bf16.mxu0 %v1595_v2  ;;  %v1969_v50 = vld [vmem:[#allocation2 + $0xf0] ss:$8 sps:$4 sm:$0xff]  }
  0x35   :  { %1822 = vmatprep.subr.bf16.mxu0 %v1914_v0  ;;  %1797 = vmatmul.mubr.bf16.vlgmr.msra.gmra.mrb[0].mxu1 %v1560_v8 }
  0x36   :  { %662 = vmatpush1.bf16.msra.mxu1 %v1927_v9  ;;  %693 = vmatprep.mubr.bf16.mxu1 %v2098_v55  ;;  %v504_v9 = vunpack.c.l.bf16 %v2236_v52 }
  0x37   :  { %663 = vmatprep.subr.bf16.mxu1 %v1935_v10 }
  0x38   :  { %1823 = vmatpush3.bf16.msra.mxu0 %v1914_v0 }
  0x39   :  { %1824 = vmatprep.subr.bf16.mxu0 %v1916_v5 }
  0x3a   :  { %664 = vmatpush1.bf16.msra.mxu1 %v1933_v11 }
  0x3b   :  { %665 = vmatprep.subr.bf16.mxu1 %v1941_v13 }
  0x3c   :  { %1825 = vmatpush3.bf16.msra.mxu0 %v1916_v5  ;;  %v506_v5 = vunpack.c.l.bf16 %v2259_v3 }
  0x3d   :  { %1826 = vmatprep.subr.bf16.mxu0 %v1918_v7 }
  0x3e   :  { %666 = vmatpush1.bf16.msra.mxu1 %v1939_v14 }
  0x3f   :  { %667 = vmatprep.subr.bf16.mxu1 %v1947_v16 }
  0x40   :  { %1827 = vmatpush3.bf16.msra.mxu0 %v1918_v7 }
  0x41   :  { %1828 = vmatprep.subr.bf16.mxu0 %v1920_v12 }
  0x42   :  { %668 = vmatpush1.bf16.msra.mxu1 %v1945_v17 }
  0x43   :  { %669 = vmatprep.subr.bf16.mxu1 %v1953_v36  ;;  %v2065_v36 = vld [vmem:[#allocation2 + $0x170] ss:$8 sps:$4 sm:$0xff]  }
  0x44   :  { %1829 = vmatpush3.bf16.msra.mxu0 %v1920_v12  ;;  %v507_v12 = vunpack.c.l.bf16 %v2263_v4 }
  0x45   :  { %1830 = vmatprep.subr.bf16.mxu0 %v1922_v15 }
  0x46   :  { %670 = vmatpush1.bf16.msra.mxu1 %v1951_v38 }
  0x47   :  { %671 = vmatprep.subr.bf16.mxu1 %v1959_v40 }
  0x48   :  { %1831 = vmatpush3.bf16.msra.mxu0 %v1922_v15  ;;  %v505_v15 = vunpack.c.l.bf16 %v2243_v57 }
  0x49   :  { %1832 = vmatprep.subr.bf16.mxu0 %v1924_v18 }
  0x4a   :  { %672 = vmatpush1.bf16.msra.mxu1 %v1957_v42  ;;  %v1986_v42 = vld [vmem:[#allocation2 + $0x194] ss:$8 sps:$4 sm:$0xff]  }
  0x4b   :  { %673 = vmatprep.subr.bf16.mxu1 %v1965_v44  ;;  %v1984_v44 = vld [vmem:[#allocation2 + $0x190] ss:$8 sps:$4 sm:$0xff]  }
  0x4c   :  { %1833 = vmatpush3.bf16.msra.mxu0 %v1924_v18 }
  0x4d   :  { %1834 = vmatprep.subr.bf16.mxu0 %v1926_v22 }
  0x4e   :  { %674 = vmatpush1.bf16.msra.mxu1 %v1963_v46  ;;  %v1992_v46 = vld [vmem:[#allocation2 + $0x1a4] ss:$8 sps:$4 sm:$0xff]  }
  0x4f   :  { %675 = vmatprep.subr.bf16.mxu1 %v1971_v48  ;;  %v1990_v48 = vld [vmem:[#allocation2 + $0x1a0] ss:$8 sps:$4 sm:$0xff]  }
  0x50   :  { %1835 = vmatpush3.bf16.msra.mxu0 %v1926_v22 }
  0x51   :  { %1155 = vmatprep.subr.bf16.mxu0 %v1932_v26 }
  0x52   :  { %676 = vmatpush1.bf16.msra.mxu1 %v1969_v50  ;;  %v1998_v50 = vld [vmem:[#allocation2 + $0x1b4] ss:$8 sps:$4 sm:$0xff]  }
  0x53   :  { %1837 = vmatmul.mubr.bf16.vlgmr.msra.gmra.mrb[0].mxu0 %v1596_v29  ;;  %794 = vmatprep.subr.bf16.mxu1 %v1977_v53  ;;  %v1996_v53 = vld [vmem:[#allocation2 + $0x1b0] ss:$8 sps:$4 sm:$0xff]  }
  0x54   :  { %1156 = vmatpush1.bf16.msra.mxu0 %v1930_v28  ;;  %1187 = vmatprep.mubr.bf16.mxu0 %v2098_v55 }
  0x55   :  { %1157 = vmatprep.subr.bf16.mxu0 %v1938_v30 }
  0x58   :  { %1158 = vmatpush1.bf16.msra.mxu0 %v1936_v31 }
  0x59   :  { %1159 = vmatprep.subr.bf16.mxu0 %v1944_v32  ;;  %v1975_v32 = vld [vmem:[#allocation2] ss:$8 sps:$4 sm:$0xff]  }
  0x5c   :  { %1160 = vmatpush1.bf16.msra.mxu0 %v1942_v33  ;;  %v1978_v33 = vld [vmem:[#allocation2 + $0x180] ss:$8 sps:$4 sm:$0xff]  }
  0x5d   :  { %1161 = vmatprep.subr.bf16.mxu0 %v1950_v34 }
  0x60   :  { %1162 = vmatpush1.bf16.msra.mxu0 %v1948_v35 }
  0x61   :  { %1163 = vmatprep.subr.bf16.mxu0 %v1956_v37 }
  0x64   :  { %1164 = vmatpush1.bf16.msra.mxu0 %v1954_v39 }
  0x65   :  { %1165 = vmatprep.subr.bf16.mxu0 %v1962_v41  ;;  %v1983_v41 = vld [vmem:[#allocation2 + $0x14] ss:$8 sps:$4 sm:$0xff]  }
  0x68   :  { %1166 = vmatpush1.bf16.msra.mxu0 %v1960_v43  ;;  %v1981_v43 = vld [vmem:[#allocation2 + $0x10] ss:$8 sps:$4 sm:$0xff]  }
  0x69   :  { %1167 = vmatprep.subr.bf16.mxu0 %v1968_v45  ;;  %v1989_v45 = vld [vmem:[#allocation2 + $0x24] ss:$8 sps:$4 sm:$0xff]  }
  0x6c   :  { %1168 = vmatpush1.bf16.msra.mxu0 %v1966_v47  ;;  %v1987_v47 = vld [vmem:[#allocation2 + $0x20] ss:$8 sps:$4 sm:$0xff]  }
  0x6d   :  { %1169 = vmatprep.subr.bf16.mxu0 %v1974_v49  ;;  %v1995_v49 = vld [vmem:[#allocation2 + $0x34] ss:$8 sps:$4 sm:$0xff]  }
  0x70   :  { %1170 = vmatpush1.bf16.msra.mxu0 %v1972_v51  ;;  %v1993_v51 = vld [vmem:[#allocation2 + $0x30] ss:$8 sps:$4 sm:$0xff]  }
  0x71   :  { %1288 = vmatprep.subr.bf16.mxu0 %v1980_v54  ;;  %v2001_v54 = vld [vmem:[#allocation2 + $0x44] ss:$8 sps:$4 sm:$0xff]  }
 0x108   :  { %v1798_v56 = vpop.f32.mrb[0].mxu1 }
 0x109   :  { %v241_v58 = vpop.f32.mrb[1].mxu1 }
 0x10a   :  { %v1799_v59 = vpop.f32.mrb[2].mxu1 }
 0x10b   :  { %v244_v60 = vpop.f32.mrb[3].mxu1 }
 0x126   :  { %v1838_v61 = vpop.f32.mrb[0].mxu0 }
 0x127   :  { %v1856_v63 = vadd.f32 %v1838_v61, %v1798_v56  ;;  %v470_v0 = vpop.f32.mrb[1].mxu0  ;;  %v2004_v56 = vld [vmem:[#allocation2 + $0x1c4] ss:$8 sps:$4 sm:$0xff]   ;;  %v2010_v61 = vld [vmem:[#allocation2 + $0x1d4] ss:$8 sps:$4 sm:$0xff]  }
 0x128   :  { %v1857_v1 = vadd.f32 %v470_v0, %v241_v58  ;;  %v1839_v2 = vpop.f32.mrb[2].mxu0  ;;  %v1999_v58 = vld [vmem:[#allocation2 + $0x40] ss:$8 sps:$4 sm:$0xff]   ;;  %v2013_v0 = vld [vmem:[#allocation2 + $0x64] ss:$8 sps:$4 sm:$0xff]  }
 0x129   :  { %v498_v6 = vadd.f32 %v1856_v63, %v1605_v62  ;;  %v1858_v7 = vadd.f32 %v1839_v2, %v1799_v59  ;;  %v473_v8 = vpop.f32.mrb[3].mxu0  ;;  %v2002_v59 = vld [vmem:[#allocation2 + $0x1c0] ss:$8 sps:$4 sm:$0xff]   ;;  %v2008_v63 = vld [vmem:[#allocation2 + $0x1d0] ss:$8 sps:$4 sm:$0xff]  }
 0x12a   :  { %v496_v10 = vadd.f32 %v1857_v1, %v1605_v62  ;;  %v1859_v11 = vadd.f32 %v473_v8, %v244_v60  ;;  %v2007_v60 = vld [vmem:[#allocation2 + $0x54] ss:$8 sps:$4 sm:$0xff]   ;;  %v2016_v1 = vld [vmem:[#allocation2 + $0x1e4] ss:$8 sps:$4 sm:$0xff]   ;;  %v2011_v2 = vld [vmem:[#allocation2 + $0x60] ss:$8 sps:$4 sm:$0xff]  }
 0x12b   :  { %v502_v13 = vmax.f32 %v498_v6, 0.0  ;;  %v499_v14 = vadd.f32 %v1858_v7, %v1605_v62  ;;  %v2019_v6 = vld [vmem:[#allocation2 + $0x74] ss:$8 sps:$4 sm:$0xff]   ;;  %v2017_v8 = vld [vmem:[#allocation2 + $0x70] ss:$8 sps:$4 sm:$0xff]  }
 0x12c   :  { %v500_v16 = vmax.f32 %v496_v10, 0.0  ;;  %v497_v17 = vadd.f32 %v1859_v11, %v1605_v62  ;;  %v2005_v62 = vld [vmem:[#allocation2 + $0x50] ss:$8 sps:$4 sm:$0xff]   ;;  %v2022_v7 = vld [vmem:[#allocation2 + $0x1f4] ss:$8 sps:$4 sm:$0xff]  }
 0x12d   :  { %v510_v18 = vadd.f32 %v506_v5, %v502_v13  ;;  %v503_v20 = vmax.f32 %v499_v14, 0.0  ;;  %v2014_v5 = vld [vmem:[#allocation2 + $0x1e0] ss:$8 sps:$4 sm:$0xff]   ;;  %v2025_v10 = vld [vmem:[#allocation2 + $0x104] ss:$8 sps:$4 sm:$0xff]  }
 0x12e   :  { %v508_v21 = vadd.f32 %v504_v9, %v500_v16  ;;  %v501_v22 = vmax.f32 %v497_v17, 0.0  ;;  %v2020_v9 = vld [vmem:[#allocation2 + $0x1f0] ss:$8 sps:$4 sm:$0xff]   ;;  %v2333_v11 = vld [vmem:[#allocation2 + $0x284] ss:$8 sps:$4 sm:$0xff]  }
 0x12f   :  { %v511_v3 = vadd.f32 %v507_v12, %v503_v20  ;;  %v533_v23 = vrot.slane %v510_v18, 1  ;;  %v520_v52 = vrot.slane %v510_v18, 7  ;;  %v2023_v12 = vld [vmem:[#allocation2 + $0x100] ss:$8 sps:$4 sm:$0xff]   ;;  %v2031_v14 = vld [vmem:[#allocation2 + $0x114] ss:$8 sps:$4 sm:$0xff]  }
 0x130   :  { %v509_v24 = vadd.f32 %v505_v15, %v501_v22  ;;  %v517_v25 = vrot.slane %v508_v21, 7  ;;  %v530_v57 = vrot.slane %v508_v21, 1  ;;  %v2335_v13 = vld [vmem:[#allocation2 + $0x280] ss:$8 sps:$4 sm:$0xff]   ;;  %v2338_v15 = vld [vmem:[#allocation2 + $0x294] ss:$8 sps:$4 sm:$0xff]  }
 0x131   :  { %v521_v26 = vrot.slane %v511_v3, 7  ;;  %v2304_v4 = vpack.c.bf16 %v511_v3, %v510_v18  ;;  %v534_v19 = vrot.slane %v511_v3, 1  ;;  %v2029_v16 = vld [vmem:[#allocation2 + $0x110] ss:$8 sps:$4 sm:$0xff]   ;;  %v2037_v18 = vld [vmem:[#allocation2 + $0x124] ss:$8 sps:$4 sm:$0xff]  }
 0x132   :  { %v518_v27 = vrot.slane %v509_v24, 7  ;;  %v531_v28 = vrot.slane %v509_v24, 1  ;;  %v2306_v29 = vpack.c.bf16 %v509_v24, %v508_v21  ;;  %v2343_v17 = vld [vmem:[#allocation2 + $0x290] ss:$8 sps:$4 sm:$0xff]   ;;  %v2040_v20 = vld [vmem:[#allocation2 + $0x2a4] ss:$8 sps:$4 sm:$0xff]  }
 0x133   :  { %v522_v30 = vsel %vm516_vm6, %v520_v52, %v521_v26  ;;  %v535_v31 = vsel %vm529_vm7, %v533_v23, %v534_v19  ;;  %v2035_v21 = vld [vmem:[#allocation2 + $0x120] ss:$8 sps:$4 sm:$0xff]   ;;  %v2043_v3 = vld [vmem:[#allocation2 + $0x134] ss:$8 sps:$4 sm:$0xff]   ;;  %v2041_v24 = vld [vmem:[#allocation2 + $0x130] ss:$8 sps:$4 sm:$0xff]  }
 0x134   :  { %v519_v34 = vsel %vm516_vm6, %v517_v25, %v518_v27  ;;  %v532_v35 = vsel %vm529_vm7, %v530_v57, %v531_v28  ;;  %v1628_v37 = vpack.c.bf16 %v522_v30, %v520_v52  ;;  %v2317_v38 = vpack.c.bf16 %v534_v19, %v535_v31  ;;  %v2038_v22 = vld [vmem:[#allocation2 + $0x2a0] ss:$8 sps:$4 sm:$0xff]   ;;  %v2046_v23 = vld [vmem:[#allocation2 + $0x2b4] ss:$8 sps:$4 sm:$0xff]   ;;  %v2044_v52 = vld [vmem:[#allocation2 + $0x2b0] ss:$8 sps:$4 sm:$0xff]  }
 0x135   :  { %v1624_v39 = vpack.c.bf16 %v519_v34, %v517_v25  ;;  %v2319_v40 = vpack.c.bf16 %v531_v28, %v532_v35  ;;  %v2049_v25 = vld [vmem:[#allocation2 + $0x144] ss:$8 sps:$4 sm:$0xff]   ;;  %v2047_v19 = vld [vmem:[#allocation2 + $0x140] ss:$8 sps:$4 sm:$0xff]   ;;  %v2055_v27 = vld [vmem:[#allocation2 + $0x154] ss:$8 sps:$4 sm:$0xff]  }
 0x136   :  { %v2052_v26 = vld [vmem:[#allocation2 + $0x2c4] ss:$8 sps:$4 sm:$0xff]   ;;  %v2050_v57 = vld [vmem:[#allocation2 + $0x2c0] ss:$8 sps:$4 sm:$0xff]   ;;  %v2053_v28 = vld [vmem:[#allocation2 + $0x150] ss:$8 sps:$4 sm:$0xff]  }
 0x137   :  { %1625 = vmatmul.mubr.msk.bf16.vlgmr.msra.gmra.mrb[4].mxu1 %vm2313_vm10, %v1624_v39  ;;  %1691 = vmatmul.mubr.msk.bf16.vlgmr.msra.gmra.mrb[4].mxu0 %vm2313_vm10, %v1624_v39  ;;  %v2061_v30 = vld [vmem:[#allocation2 + $0x164] ss:$8 sps:$4 sm:$0xff]   ;;  %v2067_v34 = vld [vmem:[#allocation2 + $0x174] ss:$8 sps:$4 sm:$0xff]  }
 0x138   :  { %795 = vmatpush1.bf16.msra.mxu1 %v1975_v32  ;;  %1289 = vmatpush1.bf16.msra.mxu0 %v1978_v33  ;;  %v2064_v31 = vld [vmem:[#allocation2 + $0x2e4] ss:$8 sps:$4 sm:$0xff]   ;;  %v2059_v32 = vld [vmem:[#allocation2 + $0x160] ss:$8 sps:$4 sm:$0xff]   ;;  %v2070_v35 = vld [vmem:[#allocation2 + $0x2f4] ss:$8 sps:$4 sm:$0xff]  }
 0x139   :  { %796 = vmatprep.subr.bf16.mxu1 %v1983_v41  ;;  %1290 = vmatprep.subr.bf16.mxu0 %v1986_v42  ;;  %v2062_v33 = vld [vmem:[#allocation2 + $0x2e0] ss:$8 sps:$4 sm:$0xff]  }
 0x13a   :  { %703 = vmatprep.mubr.bf16.mxu1 %v2098_v55  ;;  %1197 = vmatprep.mubr.bf16.mxu0 %v2098_v55 }
 0x13c   :  { %797 = vmatpush1.bf16.msra.mxu1 %v1981_v43  ;;  %1291 = vmatpush1.bf16.msra.mxu0 %v1984_v44 }
 0x13d   :  { %798 = vmatprep.subr.bf16.mxu1 %v1989_v45  ;;  %1292 = vmatprep.subr.bf16.mxu0 %v1992_v46 }
 0x13f   :  { %1629 = vmatmul.mubr.msk.bf16.gmra.mrb[8].mxu1 %vm2313_vm10, %v1628_v37  ;;  %1695 = vmatmul.mubr.msk.bf16.gmra.mrb[8].mxu0 %vm2313_vm10, %v1628_v37  ;;  %v2068_v37 = vld [vmem:[#allocation2 + $0x2f0] ss:$8 sps:$4 sm:$0xff]  }
 0x140   :  { %799 = vmatpush1.bf16.msra.mxu1 %v1987_v47  ;;  %1293 = vmatpush1.bf16.msra.mxu0 %v1990_v48 }
 0x141   :  { %800 = vmatprep.subr.bf16.mxu1 %v1995_v49  ;;  %1294 = vmatprep.subr.bf16.mxu0 %v1998_v50 }
 0x142   :  { %826 = vmatprep.mubr.bf16.mxu1 %v2098_v55  ;;  %1320 = vmatprep.mubr.bf16.mxu0 %v2098_v55 }
 0x144   :  { %801 = vmatpush1.bf16.msra.mxu1 %v1993_v51  ;;  %1295 = vmatpush1.bf16.msra.mxu0 %v1996_v53 }
 0x145   :  { %802 = vmatprep.subr.bf16.mxu1 %v2001_v54  ;;  %1296 = vmatprep.subr.bf16.mxu0 %v2004_v56 }
 0x148   :  { %803 = vmatpush1.bf16.msra.mxu1 %v1999_v58  ;;  %1297 = vmatpush1.bf16.msra.mxu0 %v2002_v59 }
 0x149   :  { %804 = vmatprep.subr.bf16.mxu1 %v2007_v60  ;;  %1298 = vmatprep.subr.bf16.mxu0 %v2010_v61 }
 0x14c   :  { %805 = vmatpush1.bf16.msra.mxu1 %v2005_v62  ;;  %1299 = vmatpush1.bf16.msra.mxu0 %v2008_v63 }
 0x14d   :  { %806 = vmatprep.subr.bf16.mxu1 %v2013_v0  ;;  %1300 = vmatprep.subr.bf16.mxu0 %v2016_v1 }
 0x150   :  { %807 = vmatpush1.bf16.msra.mxu1 %v2011_v2  ;;  %1301 = vmatpush1.bf16.msra.mxu0 %v2014_v5 }
 0x151   :  { %808 = vmatprep.subr.bf16.mxu1 %v2019_v6  ;;  %1302 = vmatprep.subr.bf16.mxu0 %v2022_v7 }
 0x154   :  { %809 = vmatpush1.bf16.msra.mxu1 %v2017_v8  ;;  %1303 = vmatpush1.bf16.msra.mxu0 %v2020_v9 }
 0x155   :  { %944 = vmatprep.subr.bf16.mxu1 %v2025_v10  ;;  %1438 = vmatprep.subr.bf16.mxu0 %v2333_v11 }
 0x157   :  { %827 = vmatmul.mubr.bf16.vlgmr.msra.gmra.mrb[4].mxu1 %v2306_v29  ;;  %1321 = vmatmul.mubr.bf16.vlgmr.msra.gmra.mrb[4].mxu0 %v2306_v29  ;;  %v2056_v29 = vld [vmem:[#allocation2 + $0x2d0] ss:$8 sps:$4 sm:$0xff]  }
 0x158   :  { %945 = vmatpush1.bf16.msra.mxu1 %v2023_v12  ;;  %1439 = vmatpush1.bf16.msra.mxu0 %v2335_v13 }
 0x159   :  { %946 = vmatprep.subr.bf16.mxu1 %v2031_v14  ;;  %1440 = vmatprep.subr.bf16.mxu0 %v2338_v15 }
 0x15a   :  { %836 = vmatprep.mubr.bf16.mxu1 %v2098_v55  ;;  %1330 = vmatprep.mubr.bf16.mxu0 %v2098_v55 }
 0x15c   :  { %947 = vmatpush1.bf16.msra.mxu1 %v2029_v16  ;;  %1441 = vmatpush1.bf16.msra.mxu0 %v2343_v17 }
 0x15d   :  { %948 = vmatprep.subr.bf16.mxu1 %v2037_v18  ;;  %1442 = vmatprep.subr.bf16.mxu0 %v2040_v20 }
 0x15f   :  { %837 = vmatmul.mubr.bf16.gmra.mrb[8].mxu1 %v2304_v4  ;;  %1331 = vmatmul.mubr.bf16.gmra.mrb[8].mxu0 %v2304_v4  ;;  %v2058_v4 = vld [vmem:[#allocation2 + $0x2d4] ss:$8 sps:$4 sm:$0xff]  }
 0x160   :  { %949 = vmatpush1.bf16.msra.mxu1 %v2035_v21  ;;  %1443 = vmatpush1.bf16.msra.mxu0 %v2038_v22 }
 0x161   :  { %950 = vmatprep.subr.bf16.mxu1 %v2043_v3  ;;  %1444 = vmatprep.subr.bf16.mxu0 %v2046_v23 }
 0x162   :  { %976 = vmatprep.mubr.bf16.mxu1 %v2098_v55  ;;  %1470 = vmatprep.mubr.bf16.mxu0 %v2098_v55 }
 0x164   :  { %951 = vmatpush1.bf16.msra.mxu1 %v2041_v24  ;;  %1445 = vmatpush1.bf16.msra.mxu0 %v2044_v52 }
 0x165   :  { %952 = vmatprep.subr.bf16.mxu1 %v2049_v25  ;;  %1446 = vmatprep.subr.bf16.mxu0 %v2052_v26 }
 0x168   :  { %953 = vmatpush1.bf16.msra.mxu1 %v2047_v19  ;;  %1447 = vmatpush1.bf16.msra.mxu0 %v2050_v57 }
 0x169   :  { %954 = vmatprep.subr.bf16.mxu1 %v2055_v27  ;;  %1448 = vmatprep.subr.bf16.mxu0 %v2058_v4 }
 0x16c   :  { %955 = vmatpush1.bf16.msra.mxu1 %v2053_v28  ;;  %1449 = vmatpush1.bf16.msra.mxu0 %v2056_v29 }
 0x16d   :  { %956 = vmatprep.subr.bf16.mxu1 %v2061_v30  ;;  %1450 = vmatprep.subr.bf16.mxu0 %v2064_v31 }
 0x170   :  { %957 = vmatpush1.bf16.msra.mxu1 %v2059_v32  ;;  %1451 = vmatpush1.bf16.msra.mxu0 %v2062_v33 }
 0x171   :  { %958 = vmatprep.subr.bf16.mxu1 %v2067_v34  ;;  %1452 = vmatprep.subr.bf16.mxu0 %v2070_v35 }
 0x174   :  { %959 = vmatpush1.bf16.msra.mxu1 %v2065_v36  ;;  %1453 = vmatpush1.bf16.msra.mxu0 %v2068_v37 }
 0x175   :  { %1840 = vmatprep.subr.bf16.mxu1 %v2333_v11 }
 0x177   :  { %1664 = vmatmul.mubr.msk.bf16.vlgmr.msra.gmra.mrb[4].mxu1 %vm2355_vm11, %v2319_v40  ;;  %1730 = vmatmul.mubr.msk.bf16.vlgmr.msra.gmra.mrb[4].mxu0 %vm2355_vm11, %v2319_v40 }
 0x178   :  { %1848 = vmatpush1.bf16.msra.mxu1 %v2335_v13  ;;  %986 = vmatprep.mubr.bf16.mxu1 %v2098_v55 }
 0x179   :  { %1841 = vmatprep.subr.bf16.mxu1 %v2338_v15 }
 0x17c   :  { %1849 = vmatpush1.bf16.msra.mxu1 %v2343_v17 }
 0x17d   :  { %1842 = vmatprep.subr.bf16.mxu1 %v2040_v20 }
 0x17f   :  { %1667 = vmatmul.mubr.msk.bf16.gmra.mrb[8].mxu1 %vm2355_vm11, %v2317_v38 }
 0x180   :  { %1850 = vmatpush1.bf16.msra.mxu1 %v2038_v22  ;;  %1480 = vmatprep.mubr.bf16.mxu1 %v2098_v55 }
 0x181   :  { %1843 = vmatprep.subr.bf16.mxu1 %v2046_v23 }
 0x184   :  { %1851 = vmatpush1.bf16.msra.mxu1 %v2044_v52 }
 0x185   :  { %1844 = vmatprep.subr.bf16.mxu1 %v2052_v26 }
 0x188   :  { %1852 = vmatpush1.bf16.msra.mxu1 %v2050_v57 }
 0x189   :  { %1845 = vmatprep.subr.bf16.mxu1 %v2058_v4 }
 0x18c   :  { %1853 = vmatpush1.bf16.msra.mxu1 %v2056_v29 }
 0x18d   :  { %1846 = vmatprep.subr.bf16.mxu1 %v2064_v31 }
 0x190   :  { %1854 = vmatpush1.bf16.msra.mxu1 %v2062_v33 }
 0x191   :  { %1847 = vmatprep.subr.bf16.mxu1 %v2070_v35 }
 0x194   :  { %1855 = vmatpush1.bf16.msra.mxu1 %v2068_v37 }
 0x197   :  { %1733 = vmatmul.mubr.msk.bf16.vlgmr.msra.gmra.mrb[12].mxu1 %vm2355_vm11, %v2317_v38 }
 0x232   :  { %v1332_v40 = vpop.f32.mrb[8].mxu0 }
 0x233   :  { %v1334_v41 = vpop.f32.mrb[9].mxu0 }
 0x234   :  { %v1336_v42 = vpop.f32.mrb[10].mxu0 }
 0x235   :  { %v1338_v43 = vpop.f32.mrb[11].mxu0 }
 0x24a   :  { %v978_v44 = vpop.f32.mrb[4].mxu1  ;;  %v1472_v55 = vpop.f32.mrb[4].mxu0 }
 0x24b   :  { %v1005_v45 = vmax.f32 %v978_v44, 0.0  ;;  %v1499_v46 = vmax.f32 %v1472_v55, 0.0  ;;  %v980_v47 = vpop.f32.mrb[5].mxu1  ;;  %v1474_v48 = vpop.f32.mrb[5].mxu0 }
 0x24c   :  { %v1006_v49 = vmax.f32 %v980_v47, 0.0  ;;  %v1500_v50 = vmax.f32 %v1474_v48, 0.0  ;;  %v982_v51 = vpop.f32.mrb[6].mxu1  ;;  %v1476_v53 = vpop.f32.mrb[6].mxu0 }
 0x24d   :  { %v1007_v54 = vmax.f32 %v982_v51, 0.0  ;;  %v1501_v56 = vmax.f32 %v1476_v53, 0.0  ;;  %v984_v58 = vpop.f32.mrb[7].mxu1  ;;  %v1478_v59 = vpop.f32.mrb[7].mxu0 }
 0x24e   :  { %v1742_v60 = vpack.c.bf16 %v1006_v49, %v1005_v45  ;;  %v1746_v38 = vpack.c.bf16 %v1500_v50, %v1499_v46  ;;  %v1008_v61 = vmax.f32 %v984_v58, 0.0  ;;  %v1502_v62 = vmax.f32 %v1478_v59, 0.0 }
 0x250   :  { %1037 = vst [vmem:[%s2405_s4] sm:$0xff] %v1742_v60  ;;  %1738 = vst [vmem:[%s2405_s4 + $0x20] sm:$0xff] %v1746_v38  ;;  %v1743_v63 = vpack.c.bf16 %v1008_v61, %v1007_v54  ;;  %v1747_v0 = vpack.c.bf16 %v1502_v62, %v1501_v56 }
 0x252   :  { %1038 = vst [vmem:[%s2405_s4 + $0x8] sm:$0xff] %v1743_v63  ;;  %1739 = vst [vmem:[%s2405_s4 + $0x28] sm:$0xff] %v1747_v0  ;;  %v988_v1 = vpop.f32.mrb[8].mxu1 }
 0x253   :  { %v1009_v2 = vmax.f32 %v988_v1, 0.0  ;;  %v990_v5 = vpop.f32.mrb[9].mxu1 }
 0x254   :  { %v1010_v6 = vmax.f32 %v990_v5, 0.0  ;;  %v992_v7 = vpop.f32.mrb[10].mxu1 }
 0x255   :  { %v1011_v8 = vmax.f32 %v992_v7, 0.0  ;;  %v994_v9 = vpop.f32.mrb[11].mxu1 }
 0x256   :  { %v1744_v10 = vpack.c.bf16 %v1010_v6, %v1009_v2  ;;  %v1012_v11 = vmax.f32 %v994_v9, 0.0 }
 0x258   :  { %1039 = vst [vmem:[%s2405_s4 + $0x10] sm:$0xff] %v1744_v10  ;;  %v1745_v12 = vpack.c.bf16 %v1012_v11, %v1011_v8 }
 0x25a   :  { %1040 = vst [vmem:[%s2405_s4 + $0x18] sm:$0xff] %v1745_v12 }
 0x26a   :  { %v1482_v13 = vpop.f32.mrb[12].mxu1 }
 0x26b   :  { %v1860_v14 = vadd.f32 %v1482_v13, %v1332_v40  ;;  %v1484_v15 = vpop.f32.mrb[13].mxu1 }
 0x26c   :  { %v1861_v16 = vadd.f32 %v1484_v15, %v1334_v41  ;;  %v1486_v17 = vpop.f32.mrb[14].mxu1 }
 0x26d   :  { %v1503_v18 = vmax.f32 %v1860_v14, 0.0  ;;  %v1862_v20 = vadd.f32 %v1486_v17, %v1336_v42  ;;  %v1488_v21 = vpop.f32.mrb[15].mxu1 }
 0x26e   :  { %v1504_v22 = vmax.f32 %v1861_v16, 0.0  ;;  %v1863_v3 = vadd.f32 %v1488_v21, %v1338_v43 }
 0x26f   :  { %v1505_v23 = vmax.f32 %v1862_v20, 0.0 }
 0x270   :  { %v1748_v24 = vpack.c.bf16 %v1504_v22, %v1503_v18  ;;  %v1506_v52 = vmax.f32 %v1863_v3, 0.0 }
 0x272   :  { %1740 = vst [vmem:[%s2405_s4 + $0x30] sm:$0xff] %v1748_v24  ;;  %v1749_v25 = vpack.c.bf16 %v1506_v52, %v1505_v23 }
 0x274   :  { %1741 = vst [vmem:[%s2405_s4 + $0x38] sm:$0xff] %v1749_v25 }
 0x275   :  { %1540 = vsyncpa [#allocation3], 1 }

</bundles_post_ra>
